<compile_context>
chip_gen: v6e
topology: v6e:2x2x1
jax: 0.10.0
libtpu: 0.0.40
codegen_flags: <defaults>
</compile_context>

<pallas_src>
import functools

import numpy as np
import jax
import jax.numpy as jnp
from jax.experimental import pallas as pl
from jax.experimental.pallas import tpu as pltpu

_CPR = 128              # channels packed per kernel row (one full lane group)
_TILE_BYTES = 4 << 20   # per-buffer tile target (safe on v5e/v6e/v7x)
_VMEM_LIMIT = 40 << 20  # raise v5e's 16 MiB scoped default; < v7x 64 MiB/TC


def _round_up(a, b):
    return ((a + b - 1) // b) * b


def _i32(v):
    """uint32 constant as a wrapped int32 jnp scalar."""
    v &= 0xFFFFFFFF
    return jnp.int32(v - (1 << 32) if v >= (1 << 31) else v)


def _keep_bits(idx_i32, seed_i32, threshold):
    """Bernoulli(keep_prob) draw per channel index.

    Counter-based hash (golden-ratio multiply + lowbias32 finalizer) of the
    global channel index and seed, compared against a 32-bit threshold.
    All arithmetic is wrapping int32 so it lowers identically in-kernel
    (Mosaic VPU), in the jnp tail path and in interpret mode.
    """
    h = idx_i32 * _i32(0x9E3779B9) + seed_i32 * _i32(0x85EBCA6B) + jnp.int32(1)
    h = h ^ jax.lax.shift_right_logical(h, 16)
    h = h * _i32(0x7FEB352D)
    h = h ^ jax.lax.shift_right_logical(h, 15)
    h = h * _i32(0x846CA68B)
    h = h ^ jax.lax.shift_right_logical(h, 16)
    # unsigned "h < threshold" via sign-bit flip + signed compare
    return (h ^ _i32(0x80000000)) < jnp.int32(threshold - (1 << 31))


def _vdropout_kernel(seed_ref, expand_ref, x_ref, o_ref, *, threshold, scale):
    """x_ref / o_ref: [tm, 128*d].  One Bernoulli draw per (row, channel)."""
    tm = x_ref.shape[0]

    # Global channel index of every packed-channel slot in this tile.
    row0 = pl.program_id(0) * tm
    rows = jax.lax.broadcasted_iota(jnp.int32, (tm, _CPR), 0) + row0
    lanes = jax.lax.broadcasted_iota(jnp.int32, (tm, _CPR), 1)
    idx = rows * _CPR + lanes

    keep = _keep_bits(idx, seed_ref[0], threshold)             # bool [tm, 128]
    keep_bf16 = keep.astype(jnp.bfloat16)                       # exact 0/1

    # Expand [tm,128] per-channel mask to [tm,128*d] lanes with a tiny MXU
    # matmul against the constant 0/1 bf16 expansion matrix (VMEM-resident,
    # DMA'd once) -> lane-dense mask, zero cross-lane data movement.
    mask = jnp.dot(keep_bf16, expand_ref[...],
                   preferred_element_type=jnp.float32)          # exact 0/1 f32

    xv = x_ref[...]
    if xv.dtype == jnp.bfloat16:
        # native-dtype multiply: halves vreg/VPU traffic, no f32 temporaries
        o_ref[...] = xv * (mask * scale).astype(jnp.bfloat16)
    else:
        o_ref[...] = (xv.astype(jnp.float32) * (mask * scale)).astype(o_ref.dtype)


def vdropout_pallas(x, drop_rate, *, training=True, seed=0):
    """Pallas TPU implementation of _VDropout.forward.

    x: [..., D]; the Bernoulli mask is drawn over x.shape[:-1] and shared
    across the last dim (vector components dropped together).
    """
    if not training or drop_rate == 0.0:
        return x                              # eval mode: identity (torch)
    assert 0.0 <= drop_rate < 1.0
    keep_prob = 1.0 - float(drop_rate)
    scale = 1.0 / keep_prob
    threshold = min(int(round(keep_prob * 2.0 ** 32)), 2 ** 32 - 1)

    orig_shape = x.shape
    d = int(orig_shape[-1])
    n_ch = 1
    for s in orig_shape[:-1]:
        n_ch *= int(s)
    flat = x.reshape(n_ch, d)                 # free reshape

    w = _CPR * d                              # lane width per kernel row
    n_bulk = (n_ch // _CPR) * _CPR            # channels handled by the kernel
    r = n_bulk // _CPR                        # kernel rows
    parts = []

    if r > 0:
        bulk = flat if n_bulk == n_ch else flat[:n_bulk]
        packed = bulk.reshape(r, w)           # free reshape (lane-dense rows)

        # Row tiling: dtype-aware, big tiles, >=2 steps when there is enough
        # work (megacore / v7x dual TC), partial trailing block allowed.
        itemsize = x.dtype.itemsize
        tm_cap = max(8, (_TILE_BYTES // (w * itemsize)) // 8 * 8)
        if r < 16:
            tm = r                            # single full-extent block
        else:
            tm = min(tm_cap, _round_up(pl.cdiv(r, 2), 8))
            tm = max(8, min(tm, (r // 8) * 8))
        grid = (pl.cdiv(r, tm),)
        # (v7x nicety: an even step count balances the 2 TCs; low priority.)

        # Constant expansion matrix E[c, l] = 1 iff lane l belongs to packed
        # channel c.  Built host-side once, exact 0/1 bf16, resident in VMEM.
        lane = np.arange(w)[None, :]
        chan = np.arange(_CPR)[:, None]
        expand = jnp.asarray((lane >= chan * d) & (lane < (chan + 1) * d),
                             dtype=jnp.bfloat16)

        seed_arr = jnp.asarray([seed], dtype=jnp.int32)
        kernel = functools.partial(_vdropout_kernel,
                                   threshold=threshold, scale=scale)

        out_packed = pl.pallas_call(
            kernel,
            out_shape=jax.ShapeDtypeStruct((r, w), x.dtype),
            grid_spec=pltpu.PrefetchScalarGridSpec(
                num_scalar_prefetch=1,
                grid=grid,
                in_specs=[
                    pl.BlockSpec((_CPR, w), lambda i, seed_ref: (0, 0)),
                    pl.BlockSpec((tm, w), lambda i, seed_ref: (i, 0)),
                ],
                out_specs=pl.BlockSpec((tm, w), lambda i, seed_ref: (i, 0)),
            ),
            compiler_params=pltpu.CompilerParams(
                dimension_semantics=("parallel",),
                vmem_limit_bytes=_VMEM_LIMIT),
        )(seed_arr, expand, packed)
        parts.append(out_packed.reshape(n_bulk, d))

    if n_bulk < n_ch:
        # <=127-channel ragged tail: tiny, handled with plain jnp using the
        # SAME hash (no whole-array pad + slice HBM round trips).
        x_tail = flat[n_bulk:]
        idx_tail = jnp.arange(n_ch - n_bulk, dtype=jnp.int32) + jnp.int32(n_bulk)
        keep_tail = _keep_bits(idx_tail, jnp.int32(seed), threshold)
        y_tail = jnp.where(keep_tail[:, None],
                           x_tail.astype(jnp.float32) * scale,
                           0.0).astype(x.dtype)
        parts.append(y_tail)

    out = parts[0] if len(parts) == 1 else jnp.concatenate(parts, axis=0)
    return out.reshape(orig_shape)


def _reference_vdropout(x, drop_rate, seed):
    """Pure-jnp reference using the same counter-based hash (testing only)."""
    keep_prob = 1.0 - float(drop_rate)
    scale = 1.0 / keep_prob
    threshold = min(int(round(keep_prob * 2.0 ** 32)), 2 ** 32 - 1)
    shape = x.shape
    d = int(shape[-1])
    n_ch = 1
    for s in shape[:-1]:
        n_ch *= int(s)
    idx = jnp.arange(n_ch, dtype=jnp.int32)
    keep = _keep_bits(idx, jnp.int32(seed), threshold)
    y = jnp.where(keep[:, None],
                  x.reshape(n_ch, d).astype(jnp.float32) * scale, 0.0)
    return y.reshape(shape).astype(x.dtype)


if __name__ == "__main__":
    key = jax.random.PRNGKey(0)
    k1, k2, k3, k4 = jax.random.split(key, 4)

    drop_rate = 0.25
    keep_prob = 1.0 - drop_rate

    # typical GVP vector-channel tensor: [nodes, vector_channels, 3]
    x = jax.random.normal(k1, (16, 32, 3), jnp.float32)

    # --- eval mode: identity -------------------------------------------------
    y_eval = vdropout_pallas(x, drop_rate, training=False)
    jax.block_until_ready(y_eval)
    assert jnp.array_equal(y_eval, x), "eval mode must be identity"

    # --- training mode -------------------------------------------------------
    y = vdropout_pallas(x, drop_rate, training=True, seed=0)
    jax.block_until_ready(y)
    assert y.shape == x.shape and y.dtype == x.dtype

    # deterministic for a fixed seed
    y2 = vdropout_pallas(x, drop_rate, training=True, seed=0)
    jax.block_until_ready(y2)
    assert jnp.array_equal(y, y2), "same seed must give the same mask"

    # each vector channel is either fully dropped or fully kept & rescaled
    kept = jnp.all(jnp.abs(y * keep_prob - x) < 1e-5, axis=-1)
    dropped = jnp.all(y == 0.0, axis=-1)
    assert bool(jnp.all(kept | dropped)), "channels must be dropped atomically"

    # empirical keep rate ~ Bernoulli(1 - p)
    rate = float(jnp.mean(kept.astype(jnp.float32)))
    assert abs(rate - keep_prob) < 0.1, f"keep rate {rate} vs {keep_prob}"

    # --- multi-grid-step case, exact match vs. shared-hash reference --------
    xl = jax.random.normal(k2, (128, 32, 3), jnp.float32)   # 4096 ch, 2 steps
    yl = vdropout_pallas(xl, drop_rate, training=True, seed=3)
    jax.block_until_ready(yl)
    yl_ref = _reference_vdropout(xl, drop_rate, seed=3)
    assert jnp.allclose(yl, yl_ref, atol=1e-6), "kernel != jnp reference"

    # --- ragged: 128-aligned bulk through the kernel + jnp tail -------------
    xr = jax.random.normal(k3, (40, 50, 3), jnp.float32)    # 2000 = 15*128 + 80
    yr = vdropout_pallas(xr, drop_rate, training=True, seed=7)
    jax.block_until_ready(yr)
    yr_ref = _reference_vdropout(xr, drop_rate, seed=7)
    assert jnp.allclose(yr, yr_ref, atol=1e-6)
    kept_r = jnp.all(jnp.abs(yr * keep_prob - xr) < 1e-5, axis=-1)
    dropped_r = jnp.all(yr == 0.0, axis=-1)
    assert bool(jnp.all(kept_r | dropped_r)), "ragged case mask not coherent"

    # --- pure tail (< 128 channels) ------------------------------------------
    xs = jax.random.normal(k4, (6, 17, 3), jnp.float32)
    ys = vdropout_pallas(xs, drop_rate, training=True, seed=11)
    jax.block_until_ready(ys)
    assert jnp.allclose(ys, _reference_vdropout(xs, drop_rate, seed=11), atol=1e-6)

    print("KERNEL_OK")
</pallas_src>

<mosaic_0001>
module attributes {stable_mosaic.version = 11 : i64} {
  func.func @_vdropout_kernel(%arg0: i32, %arg1: memref<1xi32, #tpu.memory_space<smem>>, %arg2: memref<128x384xbf16, #tpu.memory_space<vmem>>, %arg3: memref<4x384xf32, #tpu.memory_space<vmem>>, %arg4: memref<4x384xf32, #tpu.memory_space<vmem>>) attributes {dimension_semantics = [#tpu.dimension_semantics<parallel>], iteration_bounds = array<i64: 1>, scalar_prefetch = 1 : i64, scratch_operands = 0 : i64, tpu.core_type = #tpu.core_type<tc>, window_params = [{pipeline_mode = #tpu.pipeline_mode<synchronous>, transform_indices = @transform_0, window_bounds = array<i64: 128, 384>}, {transform_indices = @transform_1, window_bounds = array<i64: 4, 384>}, {transform_indices = @transform_2, window_bounds = array<i64: 4, 384>}]} {
    %c4_i32 = arith.constant 4 : i32
    %0 = arith.muli %arg0, %c4_i32 : i32
    %1 = tpu.iota {dimensions = array<i32: 0>} : vector<4x128xi32>
    %2 = vector.broadcast %0 : i32 to vector<4x128xi32>
    %3 = arith.addi %1, %2 : vector<4x128xi32>
    %4 = tpu.iota {dimensions = array<i32: 1>} : vector<4x128xi32>
    %c128_i32 = arith.constant 128 : i32
    %5 = vector.broadcast %c128_i32 : i32 to vector<4x128xi32>
    %6 = arith.muli %3, %5 : vector<4x128xi32>
    %7 = arith.addi %6, %4 : vector<4x128xi32>
    %c0 = arith.constant 0 : index
    %8 = memref.load %arg1[%c0] : memref<1xi32, #tpu.memory_space<smem>>
    %c-1640531527_i32 = arith.constant -1640531527 : i32
    %9 = vector.broadcast %c-1640531527_i32 : i32 to vector<4x128xi32>
    %10 = arith.muli %7, %9 : vector<4x128xi32>
    %c-2048144789_i32 = arith.constant -2048144789 : i32
    %11 = arith.muli %8, %c-2048144789_i32 : i32
    %12 = vector.broadcast %11 : i32 to vector<4x128xi32>
    %13 = arith.addi %10, %12 : vector<4x128xi32>
    %c1_i32 = arith.constant 1 : i32
    %14 = vector.broadcast %c1_i32 : i32 to vector<4x128xi32>
    %15 = arith.addi %13, %14 : vector<4x128xi32>
    %c16_i32 = arith.constant 16 : i32
    %16 = vector.broadcast %c16_i32 : i32 to vector<4x128xi32>
    %17 = arith.shrui %15, %16 : vector<4x128xi32>
    %18 = arith.xori %15, %17 : vector<4x128xi32>
    %c2146121005_i32 = arith.constant 2146121005 : i32
    %19 = vector.broadcast %c2146121005_i32 : i32 to vector<4x128xi32>
    %20 = arith.muli %18, %19 : vector<4x128xi32>
    %c15_i32 = arith.constant 15 : i32
    %21 = vector.broadcast %c15_i32 : i32 to vector<4x128xi32>
    %22 = arith.shrui %20, %21 : vector<4x128xi32>
    %23 = arith.xori %20, %22 : vector<4x128xi32>
    %c-2073254261_i32 = arith.constant -2073254261 : i32
    %24 = vector.broadcast %c-2073254261_i32 : i32 to vector<4x128xi32>
    %25 = arith.muli %23, %24 : vector<4x128xi32>
    %c16_i32_0 = arith.constant 16 : i32
    %26 = vector.broadcast %c16_i32_0 : i32 to vector<4x128xi32>
    %27 = arith.shrui %25, %26 : vector<4x128xi32>
    %28 = arith.xori %25, %27 : vector<4x128xi32>
    %c-2147483648_i32 = arith.constant -2147483648 : i32
    %29 = vector.broadcast %c-2147483648_i32 : i32 to vector<4x128xi32>
    %30 = arith.xori %28, %29 : vector<4x128xi32>
    %c1073741824_i32 = arith.constant 1073741824 : i32
    %31 = vector.broadcast %c1073741824_i32 : i32 to vector<4x128xi32>
    %32 = arith.cmpi slt, %30, %31 : vector<4x128xi32>
    %33 = arith.extui %32 : vector<4x128xi1> to vector<4x128xi32>
    %34 = arith.sitofp %33 : vector<4x128xi32> to vector<4x128xf32>
    %35 = arith.truncf %34 : vector<4x128xf32> to vector<4x128xbf16>
    %c0_1 = arith.constant 0 : index
    %c0_2 = arith.constant 0 : index
    %36 = vector.load %arg2[%c0_1, %c0_2] : memref<128x384xbf16, #tpu.memory_space<vmem>>, vector<128x384xbf16>
    %cst = arith.constant dense<0.000000e+00> : vector<4x384xf32>
    %37 = tpu.matmul %35, %36, %cst {dimension_numbers = #tpu.dot_dimension_numbers<[1], [0], [0], [1], [0, 0, 1, 1], [], []>} : vector<4x128xbf16>, vector<128x384xbf16>, vector<4x384xf32> -> vector<4x384xf32>
    %c0_3 = arith.constant 0 : index
    %c0_4 = arith.constant 0 : index
    %38 = vector.load %arg3[%c0_3, %c0_4] : memref<4x384xf32, #tpu.memory_space<vmem>>, vector<4x384xf32>
    %cst_5 = arith.constant 1.33333337 : f32
    %39 = vector.broadcast %cst_5 : f32 to vector<4x384xf32>
    %40 = arith.mulf %37, %39 : vector<4x384xf32>
    %41 = arith.mulf %38, %40 : vector<4x384xf32>
    %c0_6 = arith.constant 0 : index
    %c0_7 = arith.constant 0 : index
    %42 = vector.load %arg4[%c0_6, %c0_7] : memref<4x384xf32, #tpu.memory_space<vmem>>, vector<4x384xf32>
    tpu.vector_store %arg4[%c0_6, %c0_7], %41 {strides = array<i32>} : memref<4x384xf32, #tpu.memory_space<vmem>>, vector<4x384xf32>,
    return
  }
  func.func @transform_0(%arg0: i32, %arg1: memref<1xi32, #tpu.memory_space<smem>>) -> (i32, i32) {
    %c0_i32 = arith.constant 0 : i32
    %c0_i32_0 = arith.constant 0 : i32
    %c0_i32_1 = arith.constant 0 : i32
    return %c0_i32, %c0_i32_0 : i32, i32
  }
  func.func @transform_1(%arg0: i32, %arg1: memref<1xi32, #tpu.memory_space<smem>>) -> (i32, i32) {
    %c0_i32 = arith.constant 0 : i32
    %c0_i32_0 = arith.constant 0 : i32
    return %arg0, %c0_i32 : i32, i32
  }
  func.func @transform_2(%arg0: i32, %arg1: memref<1xi32, #tpu.memory_space<smem>>) -> (i32, i32) {
    %c0_i32 = arith.constant 0 : i32
    %c0_i32_0 = arith.constant 0 : i32
    return %arg0, %c0_i32 : i32, i32
  }
}

</mosaic_0001>

<bundles_post_ra>
// kernel: tpu_custom_call.1
= control target key start
LH: loop header
LB: loop body
LE: loop exit
PB: predicated region body
PF: predicated region fallthrough
CT: control target
= control target key end

     0   :  { %9 = vsyncpa [#allocation5], 0  ;;  %s554_s0 = inlined_call_operand.<no memory space> [shape: s32[1], index: 0, kind: input, shape index: {}]   ;;  %s555_s1 = inlined_call_operand.hbm [shape: bf16[128,384], index: 1, kind: input, shape index: {}]   ;;  %s556_s2 = inlined_call_operand.hbm [shape: f32[4,384], index: 2, kind: input, shape index: {}]   ;;  %s557_s3 = inlined_call_operand.hbm [shape: f32[4,384], index: 3, kind: output, shape index: {}]  }
   0x1   :  { %10 = vsyncpa [#allocation8], 0 }
   0x2   :  { %11 = vsyncpa [#allocation6], 0  ;;  %s504_s12 = smov [#allocation4]  }
   0x3   :  { %s17_s13 = sshll.u32 %s504_s12, 4  ;;  %s18_s13 = int_to_ptr.vmem [resolvable:$true] %s17_s13 }
   0x4   :  { %s446_s14 = scalar_lea.vmem %s18_s13, 3072  ;;  %p451_p1 = scmp.lt.s32.totalorder %s18_s13, %s18_s13 }
   0x5   :  { %p447_p0 = scmp.ne.s32.totalorder %s18_s13, %s446_s14  ;;  %p452_p2 = scmp.lt.s32.totalorder %s446_s14, %s446_s14 }
   0x7   :  { %p453_p3 = por %p452_p2, %p451_p1 }
   0x9   :  { %p454_p4 = pnand %p453_p3, %p447_p0 }
   0xb   :  { %457 = shalt.err (!%p454_p4)
}
   0xc   :  { %s505_s15 = smov 192   ;;  %s506_s16 = smov 12  }
   0xd   :  { %23 = dma.hbm_to_vmem [thread:$0]  %s555_s1, 3072, %s18_s13, [#allocation5], %s505_s15, %s505_s15, %s506_s16  }
   0xe   :  { %s507_s19 = smov [#allocation7]  }
   0xf   :  { %s30_s20 = sshll.u32 %s507_s19, 4  ;;  %s31_s20 = int_to_ptr.vmem [resolvable:$true] %s30_s20 }
  0x10   :  { %s466_s21 = scalar_lea.vmem %s31_s20, 192  ;;  %p471_p6 = scmp.lt.s32.totalorder %s31_s20, %s31_s20 }
  0x11   :  { %p467_p5 = scmp.ne.s32.totalorder %s31_s20, %s466_s21  ;;  %p472_p7 = scmp.lt.s32.totalorder %s466_s21, %s466_s21 }
  0x13   :  { %p473_p8 = por %p472_p7, %p471_p6 }
  0x15   :  { %p474_p9 = pnand %p473_p8, %p467_p5 }
  0x17   :  { %477 = shalt.err (!%p474_p9)
}
  0x18   :  { %33 = dma.hbm_to_vmem [thread:$0]  %s556_s2, 192, %s31_s20, [#allocation8]  }
  0x19   :  { %498 = dma.done.wait [#allocation5], 3072  }
  0x1a   :  { %499 = vsyncadd [#allocation5], 4294964224 }
  0x1b   :  { %500 = dma.done.wait [#allocation8], 192  }
  0x1c   :  { %501 = vsyncadd [#allocation8], 4294967104  ;;  %v42_v0 = vlaneseq  ;;  %v508_v1 = vmov 0.0   ;;  %vm509_vm0 = vmmov 0   ;;  %v510_v2 = vmov 0   ;;  %v310_v55 = vld [vmem:[#allocation7] sm:$0xff] }
  0x1d   :  { %377 = vmatprep.subr.bf16.mxu1 %v508_v1  ;;  %393 = vmatprep.mubr.msk.bf16.mxu1 %vm509_vm0, %v508_v1  ;;  %s52_s2 = smul.u32 2246822507, %s554_s0  ;;  %v406_v7 = vld [vmem:[#allocation4 + $0xac] ss:$12 sps:$4 sm:$0xff]   ;;  %v408_v8 = vld [vmem:[#allocation4 + $0xb0] ss:$12 sps:$4 sm:$0xff]  }
  0x1e   :  { %261 = vmatprep.mubr.bf16.mxu0 %v510_v2  ;;  %v43_v3 = vshrl.u32 %v42_v0, 7  ;;  %v47_v4 = vand.u32 127, %v42_v0  ;;  %229 = vmatprep.subr.bf16.mxu0 %v406_v7  ;;  %v409_v10 = vld [vmem:[#allocation4 + $0xa8] ss:$12 sps:$4 sm:$0xff]   ;;  %v412_v13 = vld [vmem:[#allocation4 + $0x98] ss:$12 sps:$4 sm:$0xff]  }
  0x1f   :  { %v53_v9 = vstv %s52_s2  ;;  %378 = vmatpush3.bf16.msra.mxu1 %v408_v8  ;;  %v410_v12 = vld [vmem:[#allocation4 + $0x94] ss:$12 sps:$4 sm:$0xff]   ;;  %230 = vmatpush1.bf16.msra.mxu0 %v409_v10  ;;  %v413_v14 = vld [vmem:[#allocation4 + $0x90] ss:$12 sps:$4 sm:$0xff]   ;;  %v417_v19 = vld [vmem:[#allocation4 + $0x78] ss:$12 sps:$4 sm:$0xff]  }
  0x20   :  { %v48_v5 = vmul.u32 128, %v43_v3  ;;  %379 = vmatprep.subr.bf16.mxu1 %v508_v1  ;;  %231 = vmatprep.subr.bf16.mxu0 %v410_v12  ;;  %v414_v16 = vld [vmem:[#allocation4 + $0x7c] ss:$12 sps:$4 sm:$0xff]   ;;  %v416_v17 = vld [vmem:[#allocation4 + $0x80] ss:$12 sps:$4 sm:$0xff]   ;;  %s512_s0 = smov [#allocation9]  }
  0x21   :  { %v418_v20 = vld [vmem:[#allocation4 + $0x64] ss:$12 sps:$4 sm:$0xff]   ;;  %v420_v22 = vld [vmem:[#allocation4 + $0x68] ss:$12 sps:$4 sm:$0xff]   ;;  %v421_v24 = vld [vmem:[#allocation4 + $0x60] ss:$12 sps:$4 sm:$0xff]  }
  0x22   :  { %v49_v6 = vadd.s32 %v48_v5, %v47_v4  ;;  %v422_v25 = vld [vmem:[#allocation4 + $0x4c] ss:$12 sps:$4 sm:$0xff]   ;;  %v424_v27 = vld [vmem:[#allocation4 + $0x50] ss:$12 sps:$4 sm:$0xff]   ;;  %v425_v28 = vld [vmem:[#allocation4 + $0x48] ss:$12 sps:$4 sm:$0xff]  }
  0x23   :  { %380 = vmatpush3.bf16.msra.mxu1 %v412_v13  ;;  %232 = vmatpush1.bf16.msra.mxu0 %v413_v14  ;;  %v426_v30 = vld [vmem:[#allocation4 + $0x34] ss:$12 sps:$4 sm:$0xff]   ;;  %v428_v32 = vld [vmem:[#allocation4 + $0x38] ss:$12 sps:$4 sm:$0xff]   ;;  %v429_v33 = vld [vmem:[#allocation4 + $0x30] ss:$12 sps:$4 sm:$0xff]  }
  0x24   :  { %v51_v11 = vmul.u32 2654435769, %v49_v6  ;;  %381 = vmatprep.subr.bf16.mxu1 %v508_v1  ;;  %233 = vmatprep.subr.bf16.mxu0 %v414_v16  ;;  %v430_v35 = vld [vmem:[#allocation4 + $0x1c] ss:$12 sps:$4 sm:$0xff]   ;;  %v432_v37 = vld [vmem:[#allocation4 + $0x20] ss:$12 sps:$4 sm:$0xff]  }
  0x25   :  { %v433_v38 = vld [vmem:[#allocation4 + $0x18] ss:$12 sps:$4 sm:$0xff]   ;;  %v436_v42 = vld [vmem:[#allocation4 + $0x8] ss:$12 sps:$4 sm:$0xff]   ;;  %v437_v43 = vld [vmem:[#allocation4] ss:$12 sps:$4 sm:$0xff]  }
  0x26   :  { %v54_v15 = vadd.s32 %v53_v9, %v51_v11  ;;  %v434_v40 = vld [vmem:[#allocation4 + $0x4] ss:$12 sps:$4 sm:$0xff]   ;;  %v511_v44 = vmov 1.0|1.0   ;;  %v311_v46 = vld [vmem:[#allocation7 + $0x8] sm:$0xf] }
  0x27   :  { %382 = vmatpush3.bf16.msra.mxu1 %v416_v17  ;;  %234 = vmatpush1.bf16.msra.mxu0 %v417_v19  ;;  %s329_s25 = sshll.u32 %s512_s0, 4  ;;  %s330_s25 = int_to_ptr.vmem [resolvable:$true] %s329_s25 }
  0x28   :  { %v55_v18 = vadd.s32 1, %v54_v15  ;;  %383 = vmatprep.subr.bf16.mxu1 %v508_v1  ;;  %235 = vmatprep.subr.bf16.mxu0 %v418_v20  ;;  %s478_s26 = scalar_lea.vmem %s330_s25, 192  ;;  %p483_p11 = scmp.lt.s32.totalorder %s330_s25, %s330_s25 }
  0x29   :  { %p479_p10 = scmp.ne.s32.totalorder %s330_s25, %s478_s26  ;;  %p484_p12 = scmp.lt.s32.totalorder %s478_s26, %s478_s26 }
  0x2a   :  { %v56_v21 = vshrl.u32 %v55_v18, 16 }
  0x2b   :  { %384 = vmatpush3.bf16.msra.mxu1 %v420_v22  ;;  %236 = vmatpush1.bf16.msra.mxu0 %v421_v24  ;;  %p485_p13 = por %p484_p12, %p483_p11 }
  0x2c   :  { %v57_v23 = vxor.u32 %v56_v21, %v55_v18  ;;  %385 = vmatprep.subr.bf16.mxu1 %v508_v1  ;;  %237 = vmatprep.subr.bf16.mxu0 %v422_v25 }
  0x2d   :  { %p486_p0 = pnand %p485_p13, %p479_p10 }
  0x2e   :  { %v58_v26 = vmul.u32 2146121005, %v57_v23 }
  0x2f   :  { %386 = vmatpush3.bf16.msra.mxu1 %v424_v27  ;;  %238 = vmatpush1.bf16.msra.mxu0 %v425_v28 }
  0x30   :  { %v59_v29 = vshrl.u32 %v58_v26, 15  ;;  %387 = vmatprep.subr.bf16.mxu1 %v508_v1  ;;  %239 = vmatprep.subr.bf16.mxu0 %v426_v30 }
  0x32   :  { %v60_v31 = vxor.u32 %v59_v29, %v58_v26 }
  0x33   :  { %388 = vmatpush3.bf16.msra.mxu1 %v428_v32  ;;  %240 = vmatpush1.bf16.msra.mxu0 %v429_v33 }
  0x34   :  { %v61_v34 = vmul.u32 2221713035, %v60_v31  ;;  %389 = vmatprep.subr.bf16.mxu1 %v508_v1  ;;  %241 = vmatprep.subr.bf16.mxu0 %v430_v35 }
  0x36   :  { %v62_v36 = vshrl.u32 %v61_v34, 16 }
  0x37   :  { %390 = vmatpush3.bf16.msra.mxu1 %v432_v37  ;;  %242 = vmatpush1.bf16.msra.mxu0 %v433_v38 }
  0x38   :  { %v63_v39 = vxor.u32 %v62_v36, %v61_v34  ;;  %391 = vmatprep.subr.bf16.mxu1 %v508_v1  ;;  %243 = vmatprep.subr.bf16.mxu0 %v434_v40 }
  0x3a   :  { %v64_v41 = vxor.u32 2147483648, %v63_v39 }
  0x3b   :  { %392 = vmatpush3.bf16.msra.mxu1 %v436_v42  ;;  %244 = vmatpush1.bf16.msra.mxu0 %v437_v43 }
  0x3c   :  { %vm65_vm1 = vcmp.lt.s32.totalorder %v64_v41, 1073741824 }
  0x3d   :  { %vm364_vm2 = vmpackc.low %vm65_vm1, %vm65_vm1 }
  0x3e   :  { %394 = vmatmul.mubr.msk.bf16.vlgmr.msra.gmra.mxu1 %vm364_vm2, %v511_v44  ;;  %365 = vmatmul.mubr.msk.bf16.vlgmr.msra.gmra.mxu0 %vm364_vm2, %v511_v44 }
  0xfe   :  { %v304_v45 = vpop.f32.mrf.mxu1  ;;  %v263_v48 = vpop.f32.mrf.mxu0 }
  0xff   :  { %v314_v47 = vmul.f32 1.3333334, %v304_v45  ;;  %v312_v52 = vmul.f32 1.3333334, %v263_v48 }
 0x100   :  { %v395_v49 = vpop.f32.mrf.mxu1  ;;  %v265_v51 = vpop.f32.mrf.mxu0 }
 0x101   :  { %v320_v50 = vmul.f32 %v314_v47, %v311_v46  ;;  %v313_v53 = vmul.f32 1.3333334, %v265_v51 }
 0x102   :  { %v307_v54 = vpop.f32.mrf.mxu1  ;;  %v267_v56 = vpop.f32.mrf.mxu0 }
 0x103   :  { %322 = vst [vmem:[#allocation9 + $0x8] sm:$0xf] %v320_v50  ;;  %v317_v57 = vcombine.low %v312_v52, %v313_v53 }
 0x104   :  { %v396_v58 = vpop.f32.mrf.mxu1  ;;  %v268_v59 = vpop.f32.mrf.mxu0 }
 0x105   :  { %v319_v60 = vmul.f32 %v317_v57, %v310_v55 }
 0x107   :  { %321 = vst [vmem:[#allocation9] sm:$0xff] %v319_v60 }
 0x108   :  { %489 = shalt.err (!%p486_p0)
}
 0x109   :  { %332 = dma.vmem_to_hbm [thread:$0]  %s330_s25, 192, %s557_s3, [#allocation6]  }
 0x10a   :  { %502 = dma.done.wait [#allocation6], 192  }
 0x10b   :  { %503 = vsyncadd [#allocation6], 4294967104 }
 0x10c   :  { %336 = vsyncpa [#allocation5], 1 }
 0x10d   :  { %337 = vsyncpa [#allocation8], 1 }
 0x10e   :  { %338 = vsyncpa [#allocation6], 1 }

</bundles_post_ra>
